<compile_context>
chip_gen: v6e
topology: v6e:2x2x1
jax: 0.10.0
libtpu: 0.0.40
codegen_flags: <defaults>
</compile_context>

<pallas_src>
import functools

import jax
import jax.numpy as jnp
from jax import lax
from jax.experimental import pallas as pl
from jax.experimental.pallas import tpu as pltpu


def _round_up(x, m):
    return ((x + m - 1) // m) * m


def _sigmoid_f32(x):
    # sigmoid(x) == 0.5 * tanh(0.5 * x) + 0.5 : a single EUP transcendental.
    return 0.5 * jnp.tanh(0.5 * x) + 0.5


# ---------------------------------------------------------------------------
# Kernels
# ---------------------------------------------------------------------------

def _ipd_batched_kernel(z_ref, o_ref):
    # z_ref: (TB, N, D)   o_ref: (TB, N, N)
    z = z_ref[...]
    adj = jnp.einsum("bnd,bmd->bnm", z, z, preferred_element_type=jnp.float32)
    o_ref[...] = _sigmoid_f32(adj).astype(o_ref.dtype)


def _ipd_gram_resident_kernel(z_ref, o_ref, *, tm, tn):
    # z_ref: (1, Np, D)  -- whole (padded) z of this batch, DMA'd once per batch.
    # o_ref: (1, tm, tn) -- lane-dense output tile (i, j).
    i = pl.program_id(1)
    j = pl.program_id(2)
    zr = z_ref[0, pl.ds(pl.multiple_of(i * tm, tm), tm), :]   # (tm, D)
    zc = z_ref[0, pl.ds(pl.multiple_of(j * tn, tn), tn), :]   # (tn, D)
    # Contract on D of both operands (flash-attention-style z @ z^T, no
    # explicit transpose / relayout of the column tile).
    adj = lax.dot_general(
        zr, zc,
        dimension_numbers=(((1,), (1,)), ((), ())),
        preferred_element_type=jnp.float32,
    )
    o_ref[0] = _sigmoid_f32(adj).astype(o_ref.dtype)


def _ipd_gram_tiled_kernel(zr_ref, zc_ref, o_ref):
    # Fallback for very large N where a per-batch resident z would be too big.
    # zr_ref: (1, tm, D), zc_ref: (1, tn, D), o_ref: (1, tm, tn)
    adj = lax.dot_general(
        zr_ref[0], zc_ref[0],
        dimension_numbers=(((1,), (1,)), ((), ())),
        preferred_element_type=jnp.float32,
    )
    o_ref[0] = _sigmoid_f32(adj).astype(o_ref.dtype)


# ---------------------------------------------------------------------------
# Wrapper
# ---------------------------------------------------------------------------

def _pick_tb(B, per_batch_bytes, target):
    """Largest divisor of B whose folded block stays under `target` bytes,
    preferring to keep >=2 grid steps so both v7x TensorCores get work."""
    best = 1
    for cand in range(1, B + 1):
        if B % cand == 0 and cand * per_batch_bytes <= target:
            best = cand
    if B >= 2 and best == B:
        for cand in range(1, B // 2 + 1):
            if B % cand == 0 and cand * per_batch_bytes <= target:
                best = cand
    return best


def _largest_tile(n, cap):
    """Largest multiple of 128 that divides n and is <= cap (n % 128 == 0)."""
    best = 128
    t = 128
    while t <= min(n, cap):
        if n % t == 0:
            best = t
        t += 128
    return best


@functools.partial(jax.jit, static_argnames=("dropout", "training", "out_dtype"))
def inner_product_decoder(z, *, dropout=0.0, training=False, rng_key=None,
                          out_dtype=None):
    """Pallas implementation of InnerProductDecoder.forward.

    z: (B, N, D). Returns sigmoid(z @ z^T) of shape (B, N, N).
    Pass out_dtype=jnp.bfloat16 to halve HBM store traffic (this op is
    store-bound); default keeps z.dtype for exact parity with the module.
    """
    B, N, D = z.shape
    out_dtype = z.dtype if out_dtype is None else out_dtype
    out_bytes = jnp.dtype(out_dtype).itemsize
    z_bytes = jnp.dtype(z.dtype).itemsize

    # Dropout on z (before the bmm), wrapper-side so the mask is consistent
    # between the row-tile and column-tile reads of the same z rows.
    if training and float(dropout) > 0.0:
        if rng_key is None:
            raise ValueError("rng_key is required for training-mode dropout")
        keep = 1.0 - float(dropout)
        mask = jax.random.bernoulli(rng_key, keep, z.shape)
        z = jnp.where(mask, z / keep, 0.0).astype(z.dtype)

    # ---- Path A: small/moderate N -> batch-folded full-(N, N) blocks.
    # No padding, no post-kernel slice (block last-two dims == full array dims),
    # ~2-4 MiB blocks amortize per-step overhead.  Threshold uses the f32
    # in-kernel intermediate so VMEM stays bounded even with bf16 output.
    block_target = 4 * 1024 * 1024
    per_batch_block = N * N * max(out_bytes, 4)
    if per_batch_block <= block_target:
        tb = _pick_tb(B, per_batch_block, block_target)
        return pl.pallas_call(
            _ipd_batched_kernel,
            out_shape=jax.ShapeDtypeStruct((B, N, N), out_dtype),
            grid_spec=pltpu.PrefetchScalarGridSpec(
                num_scalar_prefetch=0,
                grid=(B // tb,),
                in_specs=[pl.BlockSpec((tb, N, D), lambda b: (b, 0, 0))],
                out_specs=pl.BlockSpec((tb, N, N), lambda b: (b, 0, 0)),
            ),
            compiler_params=pltpu.CompilerParams(
                dimension_semantics=("parallel",),
                vmem_limit_bytes=32 * 1024 * 1024,
            ),
        )(z)

    # ---- Path B: large N -> lane-dense (tm, tn) output tiles.
    n_pad = _round_up(N, 128)
    if n_pad != N:
        # TODO(synk): mask-store edge tiles instead of pad+slice for large
        # ragged N; the common cases (small N, or N % 128 == 0) avoid this.
        z = jnp.pad(z, ((0, 0), (0, n_pad - N), (0, 0)))

    tm = _largest_tile(n_pad, 512)
    tn = _largest_tile(n_pad, 2048)
    grid = (B, n_pad // tm, n_pad // tn)

    # VMEM footprint of a fully-resident per-batch z (lane-padded to 128,
    # double-buffered).  If it fits comfortably, z is fed once per batch and
    # sliced in-kernel; otherwise fall back to per-tile row/col blocks.
    d_lanes = _round_up(D, 128)
    z_resident_vmem = 2 * n_pad * d_lanes * z_bytes
    col_resident = z_resident_vmem <= 12 * 1024 * 1024

    out_vmem = 2 * tm * tn * out_bytes          # double-buffered output block
    acc_vmem = tm * tn * 4                      # f32 intermediate
    if col_resident:
        in_vmem = z_resident_vmem
        kernel = functools.partial(_ipd_gram_resident_kernel, tm=tm, tn=tn)
        in_specs = [pl.BlockSpec((1, n_pad, D), lambda b, i, j: (b, 0, 0))]
        args = (z,)
    else:
        in_vmem = 2 * (tm + tn) * d_lanes * z_bytes
        kernel = _ipd_gram_tiled_kernel
        in_specs = [
            pl.BlockSpec((1, tm, D), lambda b, i, j: (b, i, 0)),
            pl.BlockSpec((1, tn, D), lambda b, i, j: (b, j, 0)),
        ]
        args = (z, z)

    vmem_limit = int(min(max(out_vmem + acc_vmem + in_vmem + (4 << 20), 16 << 20),
                         40 << 20))

    out = pl.pallas_call(
        kernel,
        out_shape=jax.ShapeDtypeStruct((B, n_pad, n_pad), out_dtype),
        grid_spec=pltpu.PrefetchScalarGridSpec(
            num_scalar_prefetch=0,
            grid=grid,
            in_specs=in_specs,
            out_specs=pl.BlockSpec((1, tm, tn), lambda b, i, j: (b, i, j)),
        ),
        compiler_params=pltpu.CompilerParams(
            dimension_semantics=("parallel", "parallel", "parallel"),
            vmem_limit_bytes=vmem_limit,
        ),
    )(*args)

    if n_pad != N:
        out = out[:, :N, :N]
    return out


if __name__ == "__main__":
    key = jax.random.PRNGKey(0)

    # Case 1: typical GAE shape (B graphs, N nodes, D latent) -> batch-folded path.
    B, N, D = 2, 128, 32
    z = jax.random.normal(key, (B, N, D), dtype=jnp.float32)
    adj = jax.block_until_ready(inner_product_decoder(z, dropout=0.5, training=False))
    ref = jax.nn.sigmoid(jnp.einsum("bnd,bmd->bnm", z, z))
    assert adj.shape == (B, N, N), adj.shape
    assert jnp.allclose(adj, ref, atol=5e-5, rtol=1e-5), float(jnp.max(jnp.abs(adj - ref)))

    # Case 2: ragged N (no padding / no post-kernel slice on this path).
    z2 = jax.random.normal(jax.random.PRNGKey(1), (2, 200, 32), dtype=jnp.float32)
    adj2 = jax.block_until_ready(inner_product_decoder(z2))
    ref2 = jax.nn.sigmoid(jnp.einsum("bnd,bmd->bnm", z2, z2))
    assert adj2.shape == (2, 200, 200), adj2.shape
    assert jnp.allclose(adj2, ref2, atol=5e-5, rtol=1e-5), float(jnp.max(jnp.abs(adj2 - ref2)))

    # Case 3: larger N with B=1 -> lane-dense tiled path, resident col z,
    # >=2 row tiles so a v7x megacore can split the grid.
    z3 = jax.random.normal(jax.random.PRNGKey(2), (1, 1536, 32), dtype=jnp.float32)
    adj3 = jax.block_until_ready(inner_product_decoder(z3))
    ref3 = jax.nn.sigmoid(jnp.einsum("bnd,bmd->bnm", z3, z3))
    assert adj3.shape == (1, 1536, 1536), adj3.shape
    assert jnp.allclose(adj3, ref3, atol=5e-5, rtol=1e-5), float(jnp.max(jnp.abs(adj3 - ref3)))

    # Case 4: bf16 output option (halves HBM store traffic on this store-bound op).
    adj4 = jax.block_until_ready(inner_product_decoder(z, out_dtype=jnp.bfloat16))
    assert adj4.dtype == jnp.bfloat16
    assert jnp.allclose(adj4.astype(jnp.float32), ref, atol=1e-2, rtol=1e-2)

    # Case 5: training-mode dropout (wrapper-side mask, PyTorch F.dropout semantics).
    adj5 = jax.block_until_ready(
        inner_product_decoder(z, dropout=0.5, training=True,
                              rng_key=jax.random.PRNGKey(3)))
    assert adj5.shape == (B, N, N)
    assert bool(jnp.all((adj5 >= 0.0) & (adj5 <= 1.0)))

    print("KERNEL_OK")
</pallas_src>

<mosaic_0001>
module attributes {stable_mosaic.version = 11 : i64} {
  func.func @_ipd_batched_kernel(%arg0: i32, %arg1: memref<1x128x32xf32, #tpu.memory_space<vmem>>, %arg2: memref<1x128x128xf32, #tpu.memory_space<vmem>>) attributes {dimension_semantics = [#tpu.dimension_semantics<parallel>], iteration_bounds = array<i64: 2>, scalar_prefetch = 0 : i64, scratch_operands = 0 : i64, tpu.core_type = #tpu.core_type<tc>, window_params = [{transform_indices = @transform_0, window_bounds = array<i64: 1, 128, 32>}, {transform_indices = @transform_1, window_bounds = array<i64: 1, 128, 128>}]} {
    %c0 = arith.constant 0 : index
    %c0_0 = arith.constant 0 : index
    %c0_1 = arith.constant 0 : index
    %0 = vector.load %arg1[%c0, %c0_0, %c0_1] : memref<1x128x32xf32, #tpu.memory_space<vmem>>, vector<1x128x32xf32>
    "tpu.trace_start"() <{level = 10 : i32, message = "bnd,bmd->bnm"}> : () -> ()
    %cst = arith.constant dense<0.000000e+00> : vector<1x128x128xf32>
    %1 = tpu.matmul %0, %0, %cst {dimension_numbers = #tpu.dot_dimension_numbers<[2], [2], [1], [1], [0, 0, 0, 1, 1, 1], [0], [0]>} : vector<1x128x32xf32>, vector<1x128x32xf32>, vector<1x128x128xf32> -> vector<1x128x128xf32>
    "tpu.trace_stop"() : () -> ()
    %cst_2 = arith.constant 5.000000e-01 : f32
    %2 = vector.broadcast %cst_2 : f32 to vector<1x128x128xf32>
    %3 = arith.mulf %2, %1 : vector<1x128x128xf32>
    %4 = math.tanh %3 : vector<1x128x128xf32>
    %cst_3 = arith.constant 5.000000e-01 : f32
    %5 = vector.broadcast %cst_3 : f32 to vector<1x128x128xf32>
    %6 = arith.mulf %5, %4 : vector<1x128x128xf32>
    %cst_4 = arith.constant 5.000000e-01 : f32
    %7 = vector.broadcast %cst_4 : f32 to vector<1x128x128xf32>
    %8 = arith.addf %6, %7 : vector<1x128x128xf32>
    %c0_5 = arith.constant 0 : index
    %c0_6 = arith.constant 0 : index
    %c0_7 = arith.constant 0 : index
    %9 = vector.load %arg2[%c0_5, %c0_6, %c0_7] : memref<1x128x128xf32, #tpu.memory_space<vmem>>, vector<1x128x128xf32>
    tpu.vector_store %arg2[%c0_5, %c0_6, %c0_7], %8 {strides = array<i32>} : memref<1x128x128xf32, #tpu.memory_space<vmem>>, vector<1x128x128xf32>,
    return
  }
  func.func @transform_0(%arg0: i32) -> (i32, i32, i32) {
    %c0_i32 = arith.constant 0 : i32
    %c0_i32_0 = arith.constant 0 : i32
    %c0_i32_1 = arith.constant 0 : i32
    return %arg0, %c0_i32, %c0_i32_0 : i32, i32, i32
  }
  func.func @transform_1(%arg0: i32) -> (i32, i32, i32) {
    %c0_i32 = arith.constant 0 : i32
    %c0_i32_0 = arith.constant 0 : i32
    %c0_i32_1 = arith.constant 0 : i32
    return %arg0, %c0_i32, %c0_i32_0 : i32, i32, i32
  }
}

</mosaic_0001>

<bundles_post_ra>
// kernel: inner_product_decoder.1
= control target key start
LH: loop header
LB: loop body
LE: loop exit
PB: predicated region body
PF: predicated region fallthrough
CT: control target
= control target key end

     0   :  { %6 = vsyncpa [#allocation3], 0  ;;  %s1060_s0 = inlined_call_operand.vmem [shape: f32[2,128,32], index: 0, kind: input, shape index: {}]   ;;  %s1061_s1 = inlined_call_operand.hbm [shape: f32[2,128,128], index: 1, kind: output, shape index: {}]  }
   0x1   :  { %8 = vsyncpa [#allocation3 + $0x1], 0  ;;  %s795_s6 = smov 0   ;;  %s797_s7 = smov 0  }
   0x2   :  { %s799_s8 = smov 0   ;;  %s801_s9 = smov 0  }
   0x3 LB: > { %s816_s10 = sadd.s32 4294967295, %s780_s9   ;;  %s481_s11 = sadd.s32 4294967294, %s780_s9   ;;  %s780_s9 = sphi %s801_s9, %s1067_s9   ;;  %s776_s8 = sphi %s799_s8, %s1066_s8   ;;  %s772_s7 = sphi %s797_s7, %s1065_s7   ;;  %s768_s6 = sphi %s795_s6, %s1064_s6  }
   0x4   : > { %s820_s12 = sadd.s32 1, %s780_s9   ;;  %s47_s13 = sadd.s32 1, %s776_s8 }
   0x5   : > { %s44_s14 = ssub.s32 %s780_s9, %s820_s12  ;;  %p57_p0 = scmp.ne.s32.totalorder %s776_s8, %s772_s7 }
   0x6   : > { %p45_p1 = scmp.eq.s32.totalorder %s44_s14, 0  ;;  %p58_p2 = scmp.eq.s32.totalorder %s816_s10, 1 }
   0x7   : > { %p63_p3 = scmp.ne.s32.totalorder %s772_s7, %s768_s6  ;;  %p64_p4 = scmp.eq.s32.totalorder %s481_s11, 1 }
   0x8   : > { %s831_s15 = scalar_select %p45_p1, %s776_s8, %s47_s13  }
   0x9   : > { %p833_p5 = por %p58_p2, %p57_p0  ;;  %p837_p6 = por %p64_p4, %p63_p3 }
   0xa   : > { %p484_p7 = scmp.ge.s32.totalorder %s780_s9, 1  ;;  %p90_p8 = scmp.lt.s32.totalorder %s780_s9, 3 }
   0xc   : > { %p91_p9 = pnand %p484_p7, %p90_p8 }
   0xd   : > { %p110_p10 = scmp.lt.s32.totalorder (!%p91_p9), %s816_s10, 1  ;;  %s107_s23 = sand.u32 (!%p91_p9), 1, %s772_s7  }
   0xe   : > { %94 = sbr.rel (%p91_p9) target bundleno = 330 (0x14a), region = 24  ;;  %s485_s24 = sshll.u32 (!%p91_p9), %s107_s23, 7 }
   0xf   : > { %s991_s25 = scalar_lea.vmem (!%p91_p9), [#allocation2], %s485_s24  ;;  %s526_s26 = sshll.u32 (!%p91_p9), %s816_s10, 11 }
  0x10   : > { %s419_s27 = sshll.u32 (!%p91_p9), %s991_s25, 4  ;;  %s1011_s30 = scalar_lea.hbm (!%p91_p9), %s1061_s1, %s526_s26  ;;  %s1013_s27 = int_to_ptr.vmem [resolvable:$true] %s419_s27 }
  0x11   : > { %s1020_s2 = scalar_lea.sflag (!%p91_p9), [#allocation3], %s107_s23  ;;  %s720_s3 = scalar_lea.vmem (!%p91_p9), %s1013_s27, 2048 }
  0x12   : > { %p721_p11 = scmp.ne.s32.totalorder (!%p91_p9), %s1013_s27, %s720_s3  ;;  %s782_s4 = smov (!%p91_p9), [#allocation2]  }
  0x13   : > { %s111_s18 = scalar_select %p110_p10, %s816_s10, 1  ;;  %vm131_vm0 = vcmask 261120  }
  0x14   : > { %p722_p12 = pnand %p721_p11, %p833_p5  ;;  %s724_s5 = sshll.u32 %s782_s4, 4  ;;  %s725_s5 = int_to_ptr.vmem [resolvable:$false] %s724_s5 }
  0x15   : > { %s525_s19 = sshll.u32 %s111_s18, 7  ;;  %s726_s10 = scalar_lea.vmem %s725_s5, 4096 }
  0x16   : > { %s848_s22 = scalar_lea.vmem %s1060_s0, %s525_s19  ;;  %p723_p13 = pneg %p722_p12 }
  0x17   : > { %v851_v0 = vld [vmem:[%s848_s22 + $0x78] sm:$0xff]  ;;  %v854_v1 = vld [vmem:[%s848_s22 + $0x70] sm:$0xff]  ;;  %v123_v2 = vld [vmem:[%s848_s22 + $0x40] sm:$0xff]  ;;  %p727_p0 = scmp.lt.s32.totalorder %s1013_s27, %s725_s5  ;;  %p728_p1 = scmp.lt.s32.totalorder %s726_s10, %s720_s3 }
  0x18   : > { %559 = vmatprep.subr.msk.mxu0 %vm131_vm0, %v851_v0  ;;  %615 = vmatprep.subr.msk.mxu1 %vm131_vm0, %v851_v0  ;;  %v870_v3 = vld [vmem:[%s848_s22 + $0x68] sm:$0xff]  ;;  %v882_v4 = vld [vmem:[%s848_s22] sm:$0xff]  ;;  %v898_v6 = vld [vmem:[%s848_s22 + $0x58] sm:$0xff] }
  0x19   : > { %560 = vmatpush3.xpose.msk.msra.mxu0 %vm131_vm0, %v851_v0  ;;  %631 = vmatpush3.xpose.msk.msra.mxu1 %vm131_vm0, %v851_v0  ;;  %v885_v5 = vld [vmem:[%s848_s22 + $0x60] sm:$0xff]  ;;  %v125_v7 = vld [vmem:[%s848_s22 + $0x50] sm:$0xff]  ;;  %v124_v8 = vld [vmem:[%s848_s22 + $0x48] sm:$0xff]  ;;  %p729_p2 = por %p728_p1, %p727_p0 }
  0x1a   : > { %561 = vmatprep.subr.msk.mxu0 %vm131_vm0, %v854_v1  ;;  %616 = vmatprep.subr.msk.mxu1 %vm131_vm0, %v854_v1  ;;  %v122_v9 = vld [vmem:[%s848_s22 + $0x38] sm:$0xff]  ;;  %v121_v10 = vld [vmem:[%s848_s22 + $0x30] sm:$0xff]  ;;  %v120_v11 = vld [vmem:[%s848_s22 + $0x28] sm:$0xff] }
  0x1b   : > { %603 = vmatprep.mubr.msk.f32.mxu1 %vm131_vm0, %v123_v2  ;;  %591 = vmatprep.mubr.msk.f32.mxu0 %vm131_vm0, %v882_v4  ;;  %v119_v12 = vld [vmem:[%s848_s22 + $0x20] sm:$0xff]  ;;  %v118_v13 = vld [vmem:[%s848_s22 + $0x18] sm:$0xff]  ;;  %v117_v14 = vld [vmem:[%s848_s22 + $0x10] sm:$0xff]  ;;  %p730_p3 = pnand %p729_p2, %p723_p13 }
  0x1c   : > { %v116_v15 = vld [vmem:[%s848_s22 + $0x8] sm:$0xff] }
  0x1d   : > { %562 = vmatpush3.xpose.msk.msra.mxu0 %vm131_vm0, %v854_v1  ;;  %632 = vmatpush3.xpose.msk.msra.mxu1 %vm131_vm0, %v854_v1 }
  0x1e   : > { %563 = vmatprep.subr.msk.mxu0 %vm131_vm0, %v870_v3  ;;  %617 = vmatprep.subr.msk.mxu1 %vm131_vm0, %v870_v3 }
  0x21   : > { %564 = vmatpush3.xpose.msk.msra.mxu0 %vm131_vm0, %v870_v3  ;;  %633 = vmatpush3.xpose.msk.msra.mxu1 %vm131_vm0, %v870_v3 }
  0x22   : > { %565 = vmatprep.subr.msk.mxu0 %vm131_vm0, %v885_v5  ;;  %618 = vmatprep.subr.msk.mxu1 %vm131_vm0, %v885_v5 }
  0x25   : > { %566 = vmatpush3.xpose.msk.msra.mxu0 %vm131_vm0, %v885_v5  ;;  %634 = vmatpush3.xpose.msk.msra.mxu1 %vm131_vm0, %v885_v5 }
  0x26   : > { %567 = vmatprep.subr.msk.mxu0 %vm131_vm0, %v898_v6  ;;  %619 = vmatprep.subr.msk.mxu1 %vm131_vm0, %v898_v6 }
  0x29   : > { %568 = vmatpush3.xpose.msk.msra.mxu0 %vm131_vm0, %v898_v6  ;;  %635 = vmatpush3.xpose.msk.msra.mxu1 %vm131_vm0, %v898_v6 }
  0x2a   : > { %569 = vmatprep.subr.msk.mxu0 %vm131_vm0, %v125_v7  ;;  %620 = vmatprep.subr.msk.mxu1 %vm131_vm0, %v125_v7 }
  0x2d   : > { %570 = vmatpush3.xpose.msk.msra.mxu0 %vm131_vm0, %v125_v7  ;;  %636 = vmatpush3.xpose.msk.msra.mxu1 %vm131_vm0, %v125_v7 }
  0x2e   : > { %571 = vmatprep.subr.msk.mxu0 %vm131_vm0, %v124_v8  ;;  %621 = vmatprep.subr.msk.mxu1 %vm131_vm0, %v124_v8 }
  0x31   : > { %572 = vmatpush3.xpose.msk.msra.mxu0 %vm131_vm0, %v124_v8  ;;  %637 = vmatpush3.xpose.msk.msra.mxu1 %vm131_vm0, %v124_v8 }
  0x32   : > { %573 = vmatprep.subr.msk.mxu0 %vm131_vm0, %v123_v2  ;;  %622 = vmatprep.subr.msk.mxu1 %vm131_vm0, %v123_v2 }
  0x35   : > { %574 = vmatpush3.xpose.msk.msra.mxu0 %vm131_vm0, %v123_v2  ;;  %638 = vmatpush3.xpose.msk.msra.mxu1 %vm131_vm0, %v123_v2 }
  0x36   : > { %575 = vmatprep.subr.msk.mxu0 %vm131_vm0, %v122_v9  ;;  %623 = vmatprep.subr.msk.mxu1 %vm131_vm0, %v122_v9 }
  0x39   : > { %576 = vmatpush3.xpose.msk.msra.mxu0 %vm131_vm0, %v122_v9  ;;  %639 = vmatpush3.xpose.msk.msra.mxu1 %vm131_vm0, %v122_v9 }
  0x3a   : > { %577 = vmatprep.subr.msk.mxu0 %vm131_vm0, %v121_v10  ;;  %624 = vmatprep.subr.msk.mxu1 %vm131_vm0, %v121_v10 }
  0x3d   : > { %578 = vmatpush3.xpose.msk.msra.mxu0 %vm131_vm0, %v121_v10  ;;  %640 = vmatpush3.xpose.msk.msra.mxu1 %vm131_vm0, %v121_v10 }
  0x3e   : > { %579 = vmatprep.subr.msk.mxu0 %vm131_vm0, %v120_v11  ;;  %625 = vmatprep.subr.msk.mxu1 %vm131_vm0, %v120_v11 }
  0x41   : > { %580 = vmatpush3.xpose.msk.msra.mxu0 %vm131_vm0, %v120_v11  ;;  %641 = vmatpush3.xpose.msk.msra.mxu1 %vm131_vm0, %v120_v11 }
  0x42   : > { %581 = vmatprep.subr.msk.mxu0 %vm131_vm0, %v119_v12  ;;  %626 = vmatprep.subr.msk.mxu1 %vm131_vm0, %v119_v12 }
  0x45   : > { %582 = vmatpush3.xpose.msk.msra.mxu0 %vm131_vm0, %v119_v12  ;;  %642 = vmatpush3.xpose.msk.msra.mxu1 %vm131_vm0, %v119_v12 }
  0x46   : > { %583 = vmatprep.subr.msk.mxu0 %vm131_vm0, %v118_v13  ;;  %627 = vmatprep.subr.msk.mxu1 %vm131_vm0, %v118_v13 }
  0x49   : > { %584 = vmatpush3.xpose.msk.msra.mxu0 %vm131_vm0, %v118_v13  ;;  %643 = vmatpush3.xpose.msk.msra.mxu1 %vm131_vm0, %v118_v13 }
  0x4a   : > { %585 = vmatprep.subr.msk.mxu0 %vm131_vm0, %v117_v14  ;;  %628 = vmatprep.subr.msk.mxu1 %vm131_vm0, %v117_v14 }
  0x4d   : > { %586 = vmatpush3.xpose.msk.msra.mxu0 %vm131_vm0, %v117_v14  ;;  %644 = vmatpush3.xpose.msk.msra.mxu1 %vm131_vm0, %v117_v14 }
  0x4e   : > { %587 = vmatprep.subr.msk.mxu0 %vm131_vm0, %v116_v15  ;;  %629 = vmatprep.subr.msk.mxu1 %vm131_vm0, %v116_v15 }
  0x51   : > { %588 = vmatpush3.xpose.msk.msra.mxu0 %vm131_vm0, %v116_v15  ;;  %645 = vmatpush3.xpose.msk.msra.mxu1 %vm131_vm0, %v116_v15 }
  0x52   : > { %589 = vmatprep.subr.msk.mxu0 %vm131_vm0, %v882_v4  ;;  %630 = vmatprep.subr.msk.mxu1 %vm131_vm0, %v882_v4 }
  0x55   : > { %590 = vmatpush3.xpose.msk.msra.mxu0 %vm131_vm0, %v882_v4  ;;  %646 = vmatpush3.xpose.msk.msra.mxu1 %vm131_vm0, %v882_v4 }
  0x58   : > { %592 = vmatmul.mubr.msk.f32.vlgmr.msra.gmra.mxu0 %vm131_vm0, %v116_v15  ;;  %604 = vmatmul.mubr.msk.f32.vlgmr.msra.gmra.mxu1 %vm131_vm0, %v124_v8 }
  0x59   : > { %594 = vmatprep.mubr.msk.f32.mxu0 %vm131_vm0, %v117_v14  ;;  %606 = vmatprep.mubr.msk.f32.mxu1 %vm131_vm0, %v125_v7 }
  0x5c   : > { %595 = vmatmul.mubr.msk.f32.gmra.mxu0 %vm131_vm0, %v118_v13  ;;  %607 = vmatmul.mubr.msk.f32.gmra.mxu1 %vm131_vm0, %v898_v6 }
  0x5d   : > { %597 = vmatprep.mubr.msk.f32.mxu0 %vm131_vm0, %v119_v12  ;;  %609 = vmatprep.mubr.msk.f32.mxu1 %vm131_vm0, %v885_v5 }
  0x60   : > { %598 = vmatmul.mubr.msk.f32.gmra.mxu0 %vm131_vm0, %v120_v11  ;;  %610 = vmatmul.mubr.msk.f32.gmra.mxu1 %vm131_vm0, %v870_v3 }
  0x61   : > { %600 = vmatprep.mubr.msk.f32.mxu0 %vm131_vm0, %v121_v10  ;;  %612 = vmatprep.mubr.msk.f32.mxu1 %vm131_vm0, %v854_v1 }
  0x64   : > { %601 = vmatmul.mubr.msk.f32.gmra.mxu0 %vm131_vm0, %v122_v9  ;;  %613 = vmatmul.mubr.msk.f32.gmra.mxu1 %vm131_vm0, %v851_v0 }
 0x118   : > { %v593_v16 = vpop.f32.mrf.mxu0  ;;  %v605_v17 = vpop.f32.mrf.mxu1 }
 0x119   : > { %v326_v18 = vmul.f32 0.5, %v593_v16  ;;  %v334_v19 = vmul.f32 0.5, %v605_v17 }
 0x11a   : > { %v246_v20 = vpop.f32.mrf.mxu0  ;;  %v286_v21 = vpop.f32.mrf.mxu1 }
 0x11b   : > { %688 = vtanh.f32 %v326_v18  ;;  %v325_v22 = vmul.f32 0.5, %v246_v20  ;;  %v333_v23 = vmul.f32 0.5, %v286_v21 }
 0x11c   : > { %690 = vtanh.f32 %v334_v19  ;;  %v596_v24 = vpop.f32.mrf.mxu0  ;;  %v608_v25 = vpop.f32.mrf.mxu1 }
 0x11d   : > { %692 = vtanh.f32 %v325_v22  ;;  %v328_v26 = vmul.f32 0.5, %v596_v24  ;;  %v336_v27 = vmul.f32 0.5, %v608_v25 }
 0x11e   : > { %694 = vtanh.f32 %v333_v23  ;;  %v256_v28 = vpop.f32.mrf.mxu0  ;;  %v296_v29 = vpop.f32.mrf.mxu1 }
 0x11f   : > { %696 = vtanh.f32 %v328_v26  ;;  %v327_v30 = vmul.f32 0.5, %v256_v28  ;;  %v335_v31 = vmul.f32 0.5, %v296_v29 }
 0x120   : > { %698 = vtanh.f32 %v336_v27  ;;  %v599_v32 = vpop.f32.mrf.mxu0  ;;  %v611_v33 = vpop.f32.mrf.mxu1 }
 0x121   : > { %700 = vtanh.f32 %v327_v30  ;;  %v330_v34 = vmul.f32 0.5, %v599_v32  ;;  %v338_v35 = vmul.f32 0.5, %v611_v33 }
 0x122   : > { %702 = vtanh.f32 %v335_v31  ;;  %v266_v36 = vpop.f32.mrf.mxu0  ;;  %v306_v37 = vpop.f32.mrf.mxu1 }
 0x123   : > { %704 = vtanh.f32 %v330_v34  ;;  %v329_v38 = vmul.f32 0.5, %v266_v36  ;;  %v337_v39 = vmul.f32 0.5, %v306_v37 }
 0x124   : > { %706 = vtanh.f32 %v338_v35  ;;  %v602_v40 = vpop.f32.mrf.mxu0  ;;  %v614_v41 = vpop.f32.mrf.mxu1 }
 0x125   : > { %708 = vtanh.f32 %v329_v38  ;;  %v332_v42 = vmul.f32 0.5, %v602_v40  ;;  %v340_v43 = vmul.f32 0.5, %v614_v41 }
 0x126   : > { %710 = vtanh.f32 %v337_v39  ;;  %v276_v44 = vpop.f32.mrf.mxu0  ;;  %v316_v45 = vpop.f32.mrf.mxu1 }
 0x127   : > { %712 = vtanh.f32 %v332_v42  ;;  %v331_v46 = vmul.f32 0.5, %v276_v44  ;;  %v339_v47 = vmul.f32 0.5, %v316_v45 }
 0x128   : > { %v689_v48 = vpop.eup %688  ;;  %714 = vtanh.f32 %v340_v43 }
 0x129   : > { %v691_v49 = vpop.eup %690  ;;  %v358_v50 = vmul.f32 0.5, %v689_v48  ;;  %716 = vtanh.f32 %v331_v46 }
 0x12a   : > { %v693_v51 = vpop.eup %692  ;;  %v366_v52 = vmul.f32 0.5, %v691_v49  ;;  %718 = vtanh.f32 %v339_v47 }
 0x12b   : > { %v695_v53 = vpop.eup %694  ;;  %v374_v54 = vadd.f32 0.5, %v358_v50  ;;  %v357_v55 = vmul.f32 0.5, %v693_v51 }
 0x12c   : > { %v697_v56 = vpop.eup %696  ;;  %v382_v57 = vadd.f32 0.5, %v366_v52  ;;  %v365_v58 = vmul.f32 0.5, %v695_v53 }
 0x12d   : > { %v699_v59 = vpop.eup %698  ;;  %390 = vst [vmem:[%s991_s25 + $0x8] sm:$0xff] %v374_v54  ;;  %v373_v60 = vadd.f32 0.5, %v357_v55  ;;  %v360_v61 = vmul.f32 0.5, %v697_v56 }
 0x12e   : > { %v701_v62 = vpop.eup %700  ;;  %398 = vst [vmem:[%s991_s25 + $0x48] sm:$0xff] %v382_v57  ;;  %v381_v63 = vadd.f32 0.5, %v365_v58  ;;  %v368_v0 = vmul.f32 0.5, %v699_v59 }
 0x12f   : > { %v703_v1 = vpop.eup %702  ;;  %389 = vst [vmem:[%s991_s25] sm:$0xff] %v373_v60  ;;  %v376_v2 = vadd.f32 0.5, %v360_v61  ;;  %v359_v3 = vmul.f32 0.5, %v701_v62 }
 0x130   : > { %v705_v4 = vpop.eup %704  ;;  %397 = vst [vmem:[%s991_s25 + $0x40] sm:$0xff] %v381_v63  ;;  %v384_v5 = vadd.f32 0.5, %v368_v0  ;;  %v367_v6 = vmul.f32 0.5, %v703_v1 }
 0x131   : > { %v707_v7 = vpop.eup %706  ;;  %392 = vst [vmem:[%s991_s25 + $0x18] sm:$0xff] %v376_v2  ;;  %v375_v8 = vadd.f32 0.5, %v359_v3  ;;  %v362_v9 = vmul.f32 0.5, %v705_v4 }
 0x132   : > { %v709_v10 = vpop.eup %708  ;;  %400 = vst [vmem:[%s991_s25 + $0x58] sm:$0xff] %v384_v5  ;;  %v383_v11 = vadd.f32 0.5, %v367_v6  ;;  %v370_v12 = vmul.f32 0.5, %v707_v7 }
 0x133   : > { %v711_v13 = vpop.eup %710  ;;  %391 = vst [vmem:[%s991_s25 + $0x10] sm:$0xff] %v375_v8  ;;  %v378_v14 = vadd.f32 0.5, %v362_v9  ;;  %v361_v15 = vmul.f32 0.5, %v709_v10 }
 0x134   : > { %v713_v16 = vpop.eup %712  ;;  %399 = vst [vmem:[%s991_s25 + $0x50] sm:$0xff] %v383_v11  ;;  %v386_v17 = vadd.f32 0.5, %v370_v12  ;;  %v369_v18 = vmul.f32 0.5, %v711_v13 }
 0x135   : > { %v715_v19 = vpop.eup %714  ;;  %394 = vst [vmem:[%s991_s25 + $0x28] sm:$0xff] %v378_v14  ;;  %v377_v20 = vadd.f32 0.5, %v361_v15  ;;  %v364_v21 = vmul.f32 0.5, %v713_v16 }
 0x136   : > { %v717_v22 = vpop.eup %716  ;;  %402 = vst [vmem:[%s991_s25 + $0x68] sm:$0xff] %v386_v17  ;;  %v385_v23 = vadd.f32 0.5, %v369_v18  ;;  %v372_v24 = vmul.f32 0.5, %v715_v19 }
 0x137   : > { %v719_v25 = vpop.eup %718  ;;  %393 = vst [vmem:[%s991_s25 + $0x20] sm:$0xff] %v377_v20  ;;  %v380_v26 = vadd.f32 0.5, %v364_v21  ;;  %v363_v27 = vmul.f32 0.5, %v717_v22 }
 0x138   : > { %401 = vst [vmem:[%s991_s25 + $0x60] sm:$0xff] %v385_v23  ;;  %v388_v28 = vadd.f32 0.5, %v372_v24  ;;  %v371_v29 = vmul.f32 0.5, %v719_v25 }
 0x139   : > { %396 = vst [vmem:[%s991_s25 + $0x38] sm:$0xff] %v380_v26  ;;  %v379_v30 = vadd.f32 0.5, %v363_v27 }
 0x13a   : > { %404 = vst [vmem:[%s991_s25 + $0x78] sm:$0xff] %v388_v28  ;;  %v387_v31 = vadd.f32 0.5, %v371_v29 }
 0x13b   : > { %395 = vst [vmem:[%s991_s25 + $0x30] sm:$0xff] %v379_v30 }
 0x13c   : > { %403 = vst [vmem:[%s991_s25 + $0x70] sm:$0xff] %v387_v31 }
 0x13d   : > { %733 = shalt.err (!%p730_p3)
}
 0x13e   : > { %s734_s11 = scalar_lea.hbm %s1011_s30, 2048  ;;  %s738_s18 = scalar_lea.hbm %s1061_s1, 4096 }
 0x13f   : > { %p735_p4 = scmp.ne.s32.totalorder %s1011_s30, %s734_s11  ;;  %p739_p9 = scmp.lt.s32.totalorder %s1011_s30, %s1061_s1 }
 0x140   : > { %p740_p10 = scmp.lt.s32.totalorder %s738_s18, %s734_s11 }
 0x141   : > { %p736_p7 = pnand %p735_p4, %p833_p5 }
 0x142   : > { %p741_p11 = por %p740_p10, %p739_p9 }
 0x143   : > { %p737_p8 = pneg %p736_p7 }
 0x145   : > { %p742_p12 = pnand %p741_p11, %p737_p8 }
 0x147   : > { %745 = shalt.err (!%p742_p12)
}
 0x148   : > { %s783_s21 = smov 128   ;;  %s784_s22 = smov 8  }
 0x149   : > { %647 = dma.vmem_to_hbm [thread:$0]  (%p833_p5), %s1013_s27, 2048, %s1011_s30, %s1020_s2, %s783_s21, %s783_s21, %s784_s22  }
 0x14a PF: > { %p653_p13 = scmp.ge.s32.totalorder %s780_s9, 2  ;;  %s434_s23 = sand.u32 1, %s768_s6  }
 0x14b   : > { %s435_s24 = scalar_lea.sflag [#allocation3], %s434_s23 }
 0x14c   : > { %p650_p0 = pnand %p653_p13, %p837_p6 }
 0x14e   : > { %p651_p1 = pneg %p650_p0 }
 0x150   : > { %763 = dma.done.wait (%p651_p1), %s435_s24, 2048  }
 0x151   : > { %765 = vsyncadd (%p651_p1), %s435_s24, 4294965248  ;;  %p11_p2 = scmp.ge.s32.totalorder %s820_s12, 4   ;;  %s1064_s6 = smov %s772_s7 }
 0x152   : > { %s1065_s7 = smov %s776_s8  ;;  %s1066_s8 = smov %s831_s15 }
 0x153   : > { %s1067_s9 = smov %s820_s12  ;;  %13 = sbr.rel (!%p11_p2) target bundleno = 3 (0x3), region = 59 }
 0x158   :  { %440 = vsyncpa [#allocation3], 1 }
 0x159   :  { %442 = vsyncpa [#allocation3 + $0x1], 1 }

</bundles_post_ra>
